<compile_context>
chip_gen: v7x
topology: tpu7x:2x2x1
jax: 0.10.0
libtpu: 0.0.40
codegen_flags: <defaults>
</compile_context>

<pallas_src>
import functools
import math

import jax
import jax.numpy as jnp
from jax.experimental import pallas as pl
from jax.experimental.pallas import tpu as pltpu


# ----------------------------------------------------------------------------
# Fused Pallas kernel: scorer linear + gumbel perturbation + softmax
# ----------------------------------------------------------------------------

def _gumbel_softmax_scorer_kernel(feat_ref, w_ref, b_ref, g_ref, soft_ref, *, inv_tau):
    # scorer linear: (TB, D) @ (D, N) + (1, N), f32 accumulation on the MXU
    logits = (
        jnp.dot(feat_ref[...], w_ref[...], preferred_element_type=jnp.float32)
        + b_ref[...]
    )
    # gumbel-perturbed, temperature-scaled logits
    y = (logits + g_ref[...]) * inv_tau
    # numerically-stable softmax over the item axis (lane axis, 128-wide)
    y = y - jnp.max(y, axis=-1, keepdims=True)
    p = jnp.exp(y)
    denom = jnp.sum(p, axis=-1, keepdims=True)
    soft_ref[...] = p * pl.reciprocal(denom, approx=True)  # EUP vrcp, free slot


def gumbel_softmax_scores(features, w, b, gumbel, *, tau=1.0, block_rows=8):
    """softmax((features @ w + b + gumbel) / tau) along the last axis.

    features: (B, D), w: (D, N), b: (N,), gumbel: (B, N) -> (B, N) f32
    """
    B, D = features.shape
    N = w.shape[1]
    assert B % block_rows == 0, "batch must be a multiple of the row-block size"

    kernel = functools.partial(_gumbel_softmax_scorer_kernel, inv_tau=1.0 / float(tau))
    return pl.pallas_call(
        kernel,
        out_shape=jax.ShapeDtypeStruct((B, N), jnp.float32),
        grid=(B // block_rows,),
        in_specs=[
            pl.BlockSpec((block_rows, D), lambda i: (i, 0)),   # features tile
            pl.BlockSpec((D, N), lambda i: (0, 0)),            # weight (resident)
            pl.BlockSpec((1, N), lambda i: (0, 0)),            # bias   (resident)
            pl.BlockSpec((block_rows, N), lambda i: (i, 0)),   # gumbel noise tile
        ],
        out_specs=pl.BlockSpec((block_rows, N), lambda i: (i, 0)),
        compiler_params=pltpu.CompilerParams(
            dimension_semantics=("parallel",),  # dual-TC sharding on v7x
        ),
    )(features, w, b.reshape(1, N), gumbel)


# ----------------------------------------------------------------------------
# Module forward: GumbelTopKSelector
# ----------------------------------------------------------------------------

def gumbel_topk_selector(features, w, b, key, *, k, tau=1.0):
    """Returns (ste_mask, top_k_indices), matching the PyTorch forward."""
    B, _ = features.shape
    N = w.shape[1]

    gumbel = jax.random.gumbel(key, (B, N), dtype=jnp.float32)
    soft = gumbel_softmax_scores(features, w, b, gumbel, tau=tau)

    # TODO(synk): torch.topk / scatter_ have no efficient in-kernel TPU
    # equivalent at this size; jax.lax.top_k + XLA scatter are fused around
    # the kernel instead (same selected set as torch.topk(sorted=False)).
    _, top_k_idx = jax.lax.top_k(soft, k)
    hard_mask = jnp.zeros_like(soft).at[jnp.arange(B)[:, None], top_k_idx].set(1.0)
    ste_mask = jax.lax.stop_gradient(hard_mask - soft) + soft
    return ste_mask, top_k_idx


# ----------------------------------------------------------------------------
# Main
# ----------------------------------------------------------------------------

if __name__ == "__main__":
    B, D, N, K = 16, 32, 128, 16  # batch, input_dim, num_items, k

    root = jax.random.PRNGKey(0)
    k_feat, k_w, k_b, k_gumbel = jax.random.split(root, 4)

    features = jax.random.normal(k_feat, (B, D), dtype=jnp.float32)
    bound = 1.0 / math.sqrt(D)  # nn.Linear default init range
    w = jax.random.uniform(k_w, (D, N), minval=-bound, maxval=bound, dtype=jnp.float32)
    b = jax.random.uniform(k_b, (N,), minval=-bound, maxval=bound, dtype=jnp.float32)

    forward = jax.jit(functools.partial(gumbel_topk_selector, k=K, tau=1.0))
    ste_mask, top_k_idx = forward(features, w, b, k_gumbel)
    ste_mask, top_k_idx = jax.block_until_ready((ste_mask, top_k_idx))

    # --- sanity checks against a pure-JAX reference -------------------------
    gumbel_ref = jax.random.gumbel(k_gumbel, (B, N), dtype=jnp.float32)
    soft_ref = jax.nn.softmax((features @ w + b + gumbel_ref) / 1.0, axis=-1)
    _, idx_ref = jax.lax.top_k(soft_ref, K)

    assert ste_mask.shape == (B, N) and top_k_idx.shape == (B, K)
    # mask support is exactly the selected set (k ones per row, zeros elsewhere)
    assert bool(jnp.all(jnp.count_nonzero(ste_mask > 0.5, axis=-1) == K))
    # same selected set as the exact-arithmetic reference
    assert bool(jnp.all(jnp.sort(top_k_idx, axis=-1) == jnp.sort(idx_ref, axis=-1)))

    print("KERNEL_OK")
</pallas_src>

<mosaic_0001>
module attributes {stable_mosaic.version = 11 : i64} {
  func.func @_gumbel_softmax_scorer_kernel(%arg0: i32, %arg1: memref<8x32xf32, #tpu.memory_space<vmem>>, %arg2: memref<32x128xf32, #tpu.memory_space<vmem>>, %arg3: memref<1x128xf32, #tpu.memory_space<vmem>>, %arg4: memref<8x128xf32, #tpu.memory_space<vmem>>, %arg5: memref<8x128xf32, #tpu.memory_space<vmem>>) attributes {dimension_semantics = [#tpu.dimension_semantics<parallel>], iteration_bounds = array<i64: 2>, scalar_prefetch = 0 : i64, scratch_operands = 0 : i64, tpu.core_type = #tpu.core_type<tc>, window_params = [{transform_indices = @transform_0, window_bounds = array<i64: 8, 32>}, {pipeline_mode = #tpu.pipeline_mode<synchronous>, transform_indices = @transform_1, window_bounds = array<i64: 32, 128>}, {pipeline_mode = #tpu.pipeline_mode<synchronous>, transform_indices = @transform_2, window_bounds = array<i64: 1, 128>}, {transform_indices = @transform_3, window_bounds = array<i64: 8, 128>}, {transform_indices = @transform_4, window_bounds = array<i64: 8, 128>}]} {
    %c0 = arith.constant 0 : index
    %c0_0 = arith.constant 0 : index
    %0 = vector.load %arg1[%c0, %c0_0] : memref<8x32xf32, #tpu.memory_space<vmem>>, vector<8x32xf32>
    %c0_1 = arith.constant 0 : index
    %c0_2 = arith.constant 0 : index
    %1 = vector.load %arg2[%c0_1, %c0_2] : memref<32x128xf32, #tpu.memory_space<vmem>>, vector<32x128xf32>
    %cst = arith.constant dense<0.000000e+00> : vector<8x128xf32>
    %2 = tpu.matmul %0, %1, %cst {dimension_numbers = #tpu.dot_dimension_numbers<[1], [0], [0], [1], [0, 0, 1, 1], [], []>} : vector<8x32xf32>, vector<32x128xf32>, vector<8x128xf32> -> vector<8x128xf32>
    %c0_3 = arith.constant 0 : index
    %c0_4 = arith.constant 0 : index
    %3 = vector.load %arg3[%c0_3, %c0_4] : memref<1x128xf32, #tpu.memory_space<vmem>>, vector<1x128xf32>
    %4 = vector.broadcast %3 : vector<1x128xf32> to vector<8x128xf32>
    %5 = arith.addf %2, %4 : vector<8x128xf32>
    %c0_5 = arith.constant 0 : index
    %c0_6 = arith.constant 0 : index
    %6 = vector.load %arg4[%c0_5, %c0_6] : memref<8x128xf32, #tpu.memory_space<vmem>>, vector<8x128xf32>
    %7 = arith.addf %5, %6 : vector<8x128xf32>
    %cst_7 = arith.constant 1.000000e+00 : f32
    %8 = vector.broadcast %cst_7 : f32 to vector<8x128xf32>
    %9 = arith.mulf %7, %8 : vector<8x128xf32>
    %cst_8 = arith.constant dense<0xFF800000> : vector<8xf32>
    %10 = vector.multi_reduction <maximumf>, %9, %cst_8 [1] : vector<8x128xf32> to vector<8xf32>
    %11 = vector.shape_cast %10 : vector<8xf32> to vector<8x1xf32>
    %12 = vector.broadcast %11 : vector<8x1xf32> to vector<8x128xf32>
    %13 = arith.subf %9, %12 : vector<8x128xf32>
    %14 = math.exp %13 : vector<8x128xf32>
    %cst_9 = arith.constant dense<0.000000e+00> : vector<8xf32>
    %15 = vector.multi_reduction <add>, %14, %cst_9 [1] : vector<8x128xf32> to vector<8xf32>
    %16 = vector.shape_cast %15 : vector<8xf32> to vector<8x1xf32>
    %17 = tpu.reciprocal %16 {approx = true} : vector<8x1xf32> -> vector<8x1xf32>
    %18 = vector.broadcast %17 : vector<8x1xf32> to vector<8x128xf32>
    %19 = arith.mulf %14, %18 : vector<8x128xf32>
    %c0_10 = arith.constant 0 : index
    %c0_11 = arith.constant 0 : index
    %20 = vector.load %arg5[%c0_10, %c0_11] : memref<8x128xf32, #tpu.memory_space<vmem>>, vector<8x128xf32>
    tpu.vector_store %arg5[%c0_10, %c0_11], %19 {strides = array<i32>} : memref<8x128xf32, #tpu.memory_space<vmem>>, vector<8x128xf32>,
    return
  }
  func.func @transform_0(%arg0: i32) -> (i32, i32) {
    %c0_i32 = arith.constant 0 : i32
    %c0_i32_0 = arith.constant 0 : i32
    return %arg0, %c0_i32 : i32, i32
  }
  func.func @transform_1(%arg0: i32) -> (i32, i32) {
    %c0_i32 = arith.constant 0 : i32
    %c0_i32_0 = arith.constant 0 : i32
    %c0_i32_1 = arith.constant 0 : i32
    return %c0_i32, %c0_i32_0 : i32, i32
  }
  func.func @transform_2(%arg0: i32) -> (i32, i32) {
    %c0_i32 = arith.constant 0 : i32
    %c0_i32_0 = arith.constant 0 : i32
    %c0_i32_1 = arith.constant 0 : i32
    return %c0_i32, %c0_i32_0 : i32, i32
  }
  func.func @transform_3(%arg0: i32) -> (i32, i32) {
    %c0_i32 = arith.constant 0 : i32
    %c0_i32_0 = arith.constant 0 : i32
    return %arg0, %c0_i32 : i32, i32
  }
  func.func @transform_4(%arg0: i32) -> (i32, i32) {
    %c0_i32 = arith.constant 0 : i32
    %c0_i32_0 = arith.constant 0 : i32
    return %arg0, %c0_i32 : i32, i32
  }
}

</mosaic_0001>

<bundles_post_ra>
// kernel: gumbel_topk_selector.1
= control target key start
LH: loop header
LB: loop body
LE: loop exit
PB: predicated region body
PF: predicated region fallthrough
CT: control target
= control target key end

     0   :  { %s458_s15 = smov 0   ;;  %s493_s0 = inlined_call_operand.vmem [shape: f32[16,32], index: 0, kind: input, shape index: {}]   ;;  %s494_s1 = inlined_call_operand.vmem [shape: f32[32,128], index: 1, kind: input, shape index: {}]   ;;  %s495_s2 = inlined_call_operand.vmem [shape: f32[1,128], index: 2, kind: input, shape index: {}]   ;;  %s496_s3 = inlined_call_operand.vmem [shape: f32[16,128], index: 3, kind: input, shape index: {}]   ;;  %s497_s4 = inlined_call_operand.vmem [shape: f32[16,128], index: 4, kind: output, shape index: {}]  }
   0x1 LB: > { %s373_s16 = sadd.s32 4294967295, %s428_s15   ;;  %p377_p0 = scmp.ge.s32.totalorder %s428_s15, 1  ;;  %s428_s15 = sphi %s458_s15, %s14_s15  }
   0x2   : > { %p170_p1 = scmp.lt.s32.totalorder %s428_s15, 3 }
   0x4   : > { %p171_p2 = pnand %p377_p0, %p170_p1 }
   0x5   : > { %v211_v0 = vld [vmem:[%s494_s1] sm:$0xff] (!%p171_p2)  ;;  %v212_v1 = vld [vmem:[%s494_s1 + $0x8] sm:$0xff] (!%p171_p2)  ;;  %v213_v2 = vld [vmem:[%s494_s1 + $0x10] sm:$0xff] (!%p171_p2)  ;;  %v430_v3 = vmov (!%p171_p2), 0.0|0.0   ;;  %vm431_vm0 = vmmov (!%p171_p2), 0   ;;  %v432_v6 = vmov (!%p171_p2), 0.0  }
   0x6   : > { %174 = sbr.rel (%p171_p2) target bundleno = 546 (0x222), region = 36  ;;  %401 = vmatprep.subr.bf16.mxu0 (!%p171_p2), %v430_v3  ;;  %v402_v4 = vpack.c.bf16 (!%p171_p2), %v212_v1, %v211_v0  ;;  %v214_v5 = vld [vmem:[%s494_s1 + $0x18] sm:$0xff] (!%p171_p2)  ;;  %398 = vmatprep.mubr.msk.f32.mxu0 (!%p171_p2), %vm431_vm0, %v432_v6  ;;  %p198_p3 = scmp.lt.s32.totalorder (!%p171_p2), %s373_s16, 1  ;;  %vm222_vm1 = vcmask (!%p171_p2), 261120   ;;  %v381_v9 = vld [vmem:[%s495_s2] ss:$0 sm:$0xff] (!%p171_p2) }
   0x7   : > { %v405_v7 = vpack.c.bf16 (!%p171_p2), %v214_v5, %v213_v2 }
   0x8   : > { %403 = vmatpush3.bf16.msra.mxu0 (!%p171_p2), %v402_v4 }
   0x9   : > { %404 = vmatprep.subr.bf16.mxu0 (!%p171_p2), %v430_v3 }
   0xc   : > { %406 = vmatpush3.bf16.msra.mxu0 (!%p171_p2), %v405_v7 }
   0xd   : > { %s499_s16 = smov (!%p198_p3, %s373_s16), 1 }
   0xe   : > { %s378_s25 = sshll.u32 %s499_s16, 3 }
   0xf   : > { %s201_s28 = scalar_lea.vmem %s493_s0, %s378_s25  ;;  %s205_s5 = scalar_lea.vmem %s496_s3, %s378_s25 }
  0x10   : > { %v210_v8 = vld [vmem:[%s201_s28] sm:$0xff]  ;;  %s209_s10 = scalar_lea.vmem %s497_s4, %s378_s25 }
  0x11   : > { %399 = vmatmul.mubr.msk.f32.vlgmr.msra.gmra.mrb[0].mxu0 %vm222_vm1, %v210_v8  ;;  %v296_v11 = vld [vmem:[%s205_s5] sm:$0xff] }
  0xe4   : > { %v292_v10 = vpop.f32.mrb[0].mxu0 }
  0xe5   : > { %v293_v12 = vadd.f32 %v381_v9, %v292_v10  ;;  %v400_v13 = vpop.f32.mrb[1].mxu0 }
  0xe7   : > { %v297_v14 = vadd.f32 %v296_v11, %v293_v12 }
  0xe9   : > { %298 = vmax.xlane.f32.xlu0 %v297_v14 }
 0x176   : > { %v299_v15 = vpop.xlane.xlu0 %298 }
 0x177   : > { %v300_v16 = vsub.f32 %v297_v14, %v299_v15 }
 0x179   : > { %v301_v17 = vmul.f32 1.442695, %v300_v16 }
 0x17b   : > { %418 = vpow2.f32 %v301_v17 }
 0x185   : > { %v419_v18 = vpop.eup %418 }
 0x186   : > { %303 = vadd.xlane.f32.xlu0 %v419_v18 }
 0x213   : > { %v304_v19 = vpop.xlane.xlu0 %303 }
 0x214   : > { %420 = vrcp.f32 %v304_v19 }
 0x21e   : > { %v421_v20 = vpop.eup %420 }
 0x21f   : > { %v306_v21 = vmul.f32 %v421_v20, %v419_v18 }
 0x221   : > { %307 = vst [vmem:[%s209_s10] sm:$0xff] %v306_v21 }
 0x222 PF: > { %s14_s15 = sadd.s32 1, %s428_s15  }
 0x223   : > { %p11_p4 = scmp.ge.s32.totalorder %s14_s15, 4  }
 0x225   :  { %13 = sbr.rel (!%p11_p4) target bundleno = 1 (0x1), region = 69 }

</bundles_post_ra>
